<compile_context>
chip_gen: v6e
topology: v6e:2x2x1
jax: 0.10.0
libtpu: 0.0.40
codegen_flags: <defaults>
</compile_context>

<pallas_src>
import jax
import jax.numpy as jnp
from jax.experimental import pallas as pl
from jax.experimental.pallas import tpu as pltpu

HIDDEN = 128    # hidden width (matches the PyTorch module)
OUT_PAD = 128   # output padded to a full 128-lane width for unmasked stores


def _round_up(n, m):
    return (n + m - 1) // m * m


def dqn_kernel(x_ref, w1_ref, b1_ref, w2_ref, b2_ref, w3_ref, b3_ref, o_ref):
    # bf16 MXU operands, f32 accumulate; bias-add and ReLU stay in f32
    # (v5e VPU has no bf16 ALU).
    x = x_ref[...].astype(jnp.bfloat16)
    h1 = jnp.dot(x, w1_ref[...], preferred_element_type=jnp.float32) + b1_ref[...]
    h1 = jnp.maximum(h1, 0.0)
    h2 = jnp.dot(h1.astype(jnp.bfloat16), w2_ref[...],
                 preferred_element_type=jnp.float32) + b2_ref[...]
    h2 = jnp.maximum(h2, 0.0)
    out = jnp.dot(h2.astype(jnp.bfloat16), w3_ref[...],
                  preferred_element_type=jnp.float32) + b3_ref[...]
    o_ref[...] = out.astype(o_ref.dtype)  # (TB, 128) full-lane store


def dqn_forward(x, params, *, tb=1024):
    """x: (B, input_size) f32. params: dict from init_dqn_params."""
    B, in_size = x.shape
    out_size = params["out_size"]

    # Batch tile: large enough to amortize per-grid-step overhead and reach
    # the HBM roofline, small enough to stay far under v7x's 64 MiB VMEM.
    TB = min(tb, _round_up(B, 8))
    B_pad = _round_up(B, TB)
    if B_pad != B:
        x = jnp.pad(x, ((0, B_pad - B), (0, 0)))

    # Weights as bf16 MXU operands (tiny, one-time cast); biases stay f32.
    w1 = params["w1"].astype(jnp.bfloat16)
    w2 = params["w2"].astype(jnp.bfloat16)
    w3 = params["w3"].astype(jnp.bfloat16)
    b1, b2, b3 = params["b1"], params["b2"], params["b3"]

    resident = lambda i: (0, 0)  # weights/biases: same block every grid step
    out = pl.pallas_call(
        dqn_kernel,
        out_shape=jax.ShapeDtypeStruct((B_pad, OUT_PAD), jnp.float32),
        grid=(B_pad // TB,),
        in_specs=[
            pl.BlockSpec((TB, in_size), lambda i: (i, 0)),   # x: streamed/pipelined
            pl.BlockSpec((in_size, HIDDEN), resident),       # w1
            pl.BlockSpec((1, HIDDEN), resident),             # b1
            pl.BlockSpec((HIDDEN, HIDDEN), resident),        # w2
            pl.BlockSpec((1, HIDDEN), resident),             # b2
            pl.BlockSpec((HIDDEN, OUT_PAD), resident),       # w3 (zero-padded to 128)
            pl.BlockSpec((1, OUT_PAD), resident),            # b3 (zero-padded to 128)
        ],
        out_specs=pl.BlockSpec((TB, OUT_PAD), lambda i: (i, 0)),
        compiler_params=pltpu.CompilerParams(
            dimension_semantics=("parallel",)),
    )(x, w1, b1, w2, b2, w3, b3)
    return out[:B, :out_size]


def init_dqn_params(key, input_size, output_size, hidden=HIDDEN):
    """Mimics nn.Linear's U(-1/sqrt(fan_in), 1/sqrt(fan_in)); weights stored
    as (in, out), i.e. transposed vs PyTorch, so the kernel does x @ W + b."""
    ks = jax.random.split(key, 6)

    def linear(kw, kb, fan_in, fan_out):
        bound = 1.0 / jnp.sqrt(jnp.float32(fan_in))
        w = jax.random.uniform(kw, (fan_in, fan_out), jnp.float32, -bound, bound)
        b = jax.random.uniform(kb, (1, fan_out), jnp.float32, -bound, bound)
        return w, b

    w1, b1 = linear(ks[0], ks[1], input_size, hidden)
    w2, b2 = linear(ks[2], ks[3], hidden, hidden)
    w3, b3 = linear(ks[4], ks[5], hidden, output_size)
    # Zero-pad the last layer to a full 128-lane output (lane-dense store);
    # the wrapper slices back to output_size so no garbage Q-values escape.
    w3 = jnp.pad(w3, ((0, 0), (0, OUT_PAD - output_size)))
    b3 = jnp.pad(b3, ((0, 0), (0, OUT_PAD - output_size)))
    return {"w1": w1, "b1": b1, "w2": w2, "b2": b2, "w3": w3, "b3": b3,
            "out_size": output_size}


def dqn_reference_bf16(x, p):
    """Same math path as the kernel: bf16 MXU inputs, f32 accumulate."""
    bf, f32 = jnp.bfloat16, jnp.float32
    h1 = jnp.maximum(jnp.dot(x.astype(bf), p["w1"].astype(bf),
                             preferred_element_type=f32) + p["b1"], 0.0)
    h2 = jnp.maximum(jnp.dot(h1.astype(bf), p["w2"].astype(bf),
                             preferred_element_type=f32) + p["b2"], 0.0)
    out = jnp.dot(h2.astype(bf), p["w3"].astype(bf),
                  preferred_element_type=f32) + p["b3"]
    return out[:, :p["out_size"]]


def dqn_reference_f32(x, p):
    h1 = jnp.maximum(x @ p["w1"] + p["b1"], 0.0)
    h2 = jnp.maximum(h1 @ p["w2"] + p["b2"], 0.0)
    return (h2 @ p["w3"] + p["b3"])[:, :p["out_size"]]


if __name__ == "__main__":
    key = jax.random.PRNGKey(0)
    k_x, k_p, k_x2 = jax.random.split(key, 3)

    input_size = 32    # small flat observation vector
    output_size = 8    # number of discrete actions
    params = init_dqn_params(k_p, input_size, output_size)

    # Small demo batch (single grid step).
    x = jax.random.normal(k_x, (8, input_size), dtype=jnp.float32)
    out = jax.block_until_ready(dqn_forward(x, params))
    assert out.shape == (8, output_size)
    ref = dqn_reference_bf16(x, params)
    assert jnp.allclose(out, ref, atol=2e-3, rtol=2e-3)
    # Loose sanity check vs the pure-f32 PyTorch-equivalent math.
    ref32 = dqn_reference_f32(x, params)
    assert jnp.allclose(out, ref32, atol=1e-1, rtol=1e-1)

    # Larger, non-multiple batch: exercises batch tiling, padding and the
    # software-pipelined grid (grid=(5,) at tb=512).
    x2 = jax.random.normal(k_x2, (2085, input_size), dtype=jnp.float32)
    out2 = jax.block_until_ready(dqn_forward(x2, params, tb=512))
    assert out2.shape == (2085, output_size)
    ref2 = dqn_reference_bf16(x2, params)
    assert jnp.allclose(out2, ref2, atol=2e-3, rtol=2e-3)

    print("KERNEL_OK")
</pallas_src>

<mosaic_0001>
module attributes {stable_mosaic.version = 11 : i64} {
  func.func @dqn_kernel(%arg0: i32, %arg1: memref<8x32xf32, #tpu.memory_space<vmem>>, %arg2: memref<32x128xbf16, #tpu.memory_space<vmem>>, %arg3: memref<1x128xf32, #tpu.memory_space<vmem>>, %arg4: memref<128x128xbf16, #tpu.memory_space<vmem>>, %arg5: memref<1x128xf32, #tpu.memory_space<vmem>>, %arg6: memref<128x128xbf16, #tpu.memory_space<vmem>>, %arg7: memref<1x128xf32, #tpu.memory_space<vmem>>, %arg8: memref<8x128xf32, #tpu.memory_space<vmem>>) attributes {dimension_semantics = [#tpu.dimension_semantics<parallel>], iteration_bounds = array<i64: 1>, scalar_prefetch = 0 : i64, scratch_operands = 0 : i64, tpu.core_type = #tpu.core_type<tc>, window_params = [{transform_indices = @transform_0, window_bounds = array<i64: 8, 32>}, {pipeline_mode = #tpu.pipeline_mode<synchronous>, transform_indices = @transform_1, window_bounds = array<i64: 32, 128>}, {pipeline_mode = #tpu.pipeline_mode<synchronous>, transform_indices = @transform_2, window_bounds = array<i64: 1, 128>}, {pipeline_mode = #tpu.pipeline_mode<synchronous>, transform_indices = @transform_3, window_bounds = array<i64: 128, 128>}, {pipeline_mode = #tpu.pipeline_mode<synchronous>, transform_indices = @transform_4, window_bounds = array<i64: 1, 128>}, {pipeline_mode = #tpu.pipeline_mode<synchronous>, transform_indices = @transform_5, window_bounds = array<i64: 128, 128>}, {pipeline_mode = #tpu.pipeline_mode<synchronous>, transform_indices = @transform_6, window_bounds = array<i64: 1, 128>}, {transform_indices = @transform_7, window_bounds = array<i64: 8, 128>}]} {
    %c0 = arith.constant 0 : index
    %c0_0 = arith.constant 0 : index
    %0 = vector.load %arg1[%c0, %c0_0] : memref<8x32xf32, #tpu.memory_space<vmem>>, vector<8x32xf32>
    %1 = arith.truncf %0 : vector<8x32xf32> to vector<8x32xbf16>
    %c0_1 = arith.constant 0 : index
    %c0_2 = arith.constant 0 : index
    %2 = vector.load %arg2[%c0_1, %c0_2] : memref<32x128xbf16, #tpu.memory_space<vmem>>, vector<32x128xbf16>
    %cst = arith.constant dense<0.000000e+00> : vector<8x128xf32>
    %3 = tpu.matmul %1, %2, %cst {dimension_numbers = #tpu.dot_dimension_numbers<[1], [0], [0], [1], [0, 0, 1, 1], [], []>} : vector<8x32xbf16>, vector<32x128xbf16>, vector<8x128xf32> -> vector<8x128xf32>
    %c0_3 = arith.constant 0 : index
    %c0_4 = arith.constant 0 : index
    %4 = vector.load %arg3[%c0_3, %c0_4] : memref<1x128xf32, #tpu.memory_space<vmem>>, vector<1x128xf32>
    %5 = vector.broadcast %4 : vector<1x128xf32> to vector<8x128xf32>
    %6 = arith.addf %3, %5 : vector<8x128xf32>
    %cst_5 = arith.constant 0.000000e+00 : f32
    %7 = vector.broadcast %cst_5 : f32 to vector<8x128xf32>
    %8 = arith.maximumf %6, %7 : vector<8x128xf32>
    %9 = arith.truncf %8 : vector<8x128xf32> to vector<8x128xbf16>
    %c0_6 = arith.constant 0 : index
    %c0_7 = arith.constant 0 : index
    %10 = vector.load %arg4[%c0_6, %c0_7] : memref<128x128xbf16, #tpu.memory_space<vmem>>, vector<128x128xbf16>
    %cst_8 = arith.constant dense<0.000000e+00> : vector<8x128xf32>
    %11 = tpu.matmul %9, %10, %cst_8 {dimension_numbers = #tpu.dot_dimension_numbers<[1], [0], [0], [1], [0, 0, 1, 1], [], []>} : vector<8x128xbf16>, vector<128x128xbf16>, vector<8x128xf32> -> vector<8x128xf32>
    %c0_9 = arith.constant 0 : index
    %c0_10 = arith.constant 0 : index
    %12 = vector.load %arg5[%c0_9, %c0_10] : memref<1x128xf32, #tpu.memory_space<vmem>>, vector<1x128xf32>
    %13 = vector.broadcast %12 : vector<1x128xf32> to vector<8x128xf32>
    %14 = arith.addf %11, %13 : vector<8x128xf32>
    %cst_11 = arith.constant 0.000000e+00 : f32
    %15 = vector.broadcast %cst_11 : f32 to vector<8x128xf32>
    %16 = arith.maximumf %14, %15 : vector<8x128xf32>
    %17 = arith.truncf %16 : vector<8x128xf32> to vector<8x128xbf16>
    %c0_12 = arith.constant 0 : index
    %c0_13 = arith.constant 0 : index
    %18 = vector.load %arg6[%c0_12, %c0_13] : memref<128x128xbf16, #tpu.memory_space<vmem>>, vector<128x128xbf16>
    %cst_14 = arith.constant dense<0.000000e+00> : vector<8x128xf32>
    %19 = tpu.matmul %17, %18, %cst_14 {dimension_numbers = #tpu.dot_dimension_numbers<[1], [0], [0], [1], [0, 0, 1, 1], [], []>} : vector<8x128xbf16>, vector<128x128xbf16>, vector<8x128xf32> -> vector<8x128xf32>
    %c0_15 = arith.constant 0 : index
    %c0_16 = arith.constant 0 : index
    %20 = vector.load %arg7[%c0_15, %c0_16] : memref<1x128xf32, #tpu.memory_space<vmem>>, vector<1x128xf32>
    %21 = vector.broadcast %20 : vector<1x128xf32> to vector<8x128xf32>
    %22 = arith.addf %19, %21 : vector<8x128xf32>
    %c0_17 = arith.constant 0 : index
    %c0_18 = arith.constant 0 : index
    %23 = vector.load %arg8[%c0_17, %c0_18] : memref<8x128xf32, #tpu.memory_space<vmem>>, vector<8x128xf32>
    tpu.vector_store %arg8[%c0_17, %c0_18], %22 {strides = array<i32>} : memref<8x128xf32, #tpu.memory_space<vmem>>, vector<8x128xf32>,
    return
  }
  func.func @transform_0(%arg0: i32) -> (i32, i32) {
    %c0_i32 = arith.constant 0 : i32
    %c0_i32_0 = arith.constant 0 : i32
    return %arg0, %c0_i32 : i32, i32
  }
  func.func @transform_1(%arg0: i32) -> (i32, i32) {
    %c0_i32 = arith.constant 0 : i32
    %c0_i32_0 = arith.constant 0 : i32
    %c0_i32_1 = arith.constant 0 : i32
    return %c0_i32, %c0_i32_0 : i32, i32
  }
  func.func @transform_2(%arg0: i32) -> (i32, i32) {
    %c0_i32 = arith.constant 0 : i32
    %c0_i32_0 = arith.constant 0 : i32
    %c0_i32_1 = arith.constant 0 : i32
    return %c0_i32, %c0_i32_0 : i32, i32
  }
  func.func @transform_3(%arg0: i32) -> (i32, i32) {
    %c0_i32 = arith.constant 0 : i32
    %c0_i32_0 = arith.constant 0 : i32
    %c0_i32_1 = arith.constant 0 : i32
    return %c0_i32, %c0_i32_0 : i32, i32
  }
  func.func @transform_4(%arg0: i32) -> (i32, i32) {
    %c0_i32 = arith.constant 0 : i32
    %c0_i32_0 = arith.constant 0 : i32
    %c0_i32_1 = arith.constant 0 : i32
    return %c0_i32, %c0_i32_0 : i32, i32
  }
  func.func @transform_5(%arg0: i32) -> (i32, i32) {
    %c0_i32 = arith.constant 0 : i32
    %c0_i32_0 = arith.constant 0 : i32
    %c0_i32_1 = arith.constant 0 : i32
    return %c0_i32, %c0_i32_0 : i32, i32
  }
  func.func @transform_6(%arg0: i32) -> (i32, i32) {
    %c0_i32 = arith.constant 0 : i32
    %c0_i32_0 = arith.constant 0 : i32
    %c0_i32_1 = arith.constant 0 : i32
    return %c0_i32, %c0_i32_0 : i32, i32
  }
  func.func @transform_7(%arg0: i32) -> (i32, i32) {
    %c0_i32 = arith.constant 0 : i32
    %c0_i32_0 = arith.constant 0 : i32
    return %arg0, %c0_i32 : i32, i32
  }
}

</mosaic_0001>

<bundles_post_ra>
// kernel: tpu_custom_call.1
= control target key start
LH: loop header
LB: loop body
LE: loop exit
PB: predicated region body
PF: predicated region fallthrough
CT: control target
= control target key end

     0   :  { %12 = vsyncpa [#allocation3], 0  ;;  %s726_s0 = inlined_call_operand.hbm [shape: f32[8,32], index: 0, kind: input, shape index: {}]   ;;  %s727_s1 = inlined_call_operand.hbm [shape: bf16[32,128], index: 1, kind: input, shape index: {}]   ;;  %s728_s2 = inlined_call_operand.vmem [shape: f32[1,128], index: 2, kind: input, shape index: {}]   ;;  %s729_s3 = inlined_call_operand.hbm [shape: bf16[128,128], index: 3, kind: input, shape index: {}]   ;;  %s730_s4 = inlined_call_operand.vmem [shape: f32[1,128], index: 4, kind: input, shape index: {}]   ;;  %s731_s5 = inlined_call_operand.hbm [shape: bf16[128,128], index: 5, kind: input, shape index: {}]   ;;  %s732_s6 = inlined_call_operand.vmem [shape: f32[1,128], index: 6, kind: input, shape index: {}]   ;;  %s733_s7 = inlined_call_operand.hbm [shape: f32[8,128], index: 7, kind: output, shape index: {}]  }
   0x1   :  { %13 = vsyncpa [#allocation6], 0 }
   0x2   :  { %14 = vsyncpa [#allocation9], 0 }
   0x3   :  { %15 = vsyncpa [#allocation4], 0  ;;  %s620_s24 = smov [#allocation5]  }
   0x4   :  { %s31_s25 = sshll.u32 %s620_s24, 4  ;;  %s32_s25 = int_to_ptr.vmem [resolvable:$true] %s31_s25 }
   0x5   :  { %s520_s26 = scalar_lea.vmem %s32_s25, 256  ;;  %p525_p1 = scmp.lt.s32.totalorder %s32_s25, %s32_s25 }
   0x6   :  { %p521_p0 = scmp.ne.s32.totalorder %s32_s25, %s520_s26  ;;  %p526_p2 = scmp.lt.s32.totalorder %s520_s26, %s520_s26 }
   0x8   :  { %p527_p3 = por %p526_p2, %p525_p1 }
   0xa   :  { %p528_p4 = pnand %p527_p3, %p521_p0 }
   0xc   :  { %531 = shalt.err (!%p528_p4)
}
   0xd   :  { %s621_s27 = smov 64   ;;  %s622_s28 = smov 4  }
   0xe   :  { %37 = dma.hbm_to_vmem [thread:$0]  %s727_s1, 256, %s32_s25, [#allocation6], %s621_s27, %s621_s27, %s622_s28  }
   0xf   :  { %s623_s8 = smov [#allocation2]   ;;  %s624_s10 = smov [#allocation7]  }
  0x10   :  { %s22_s9 = sshll.u32 %s623_s8, 4  ;;  %s45_s11 = sshll.u32 %s624_s10, 4  ;;  %s23_s9 = int_to_ptr.vmem [resolvable:$true] %s22_s9  ;;  %s46_s11 = int_to_ptr.vmem [resolvable:$true] %s45_s11 }
  0x11   :  { %s540_s12 = scalar_lea.vmem %s23_s9, 128  ;;  %p545_p6 = scmp.lt.s32.totalorder %s23_s9, %s23_s9 }
  0x12   :  { %p541_p5 = scmp.ne.s32.totalorder %s23_s9, %s540_s12  ;;  %p546_p7 = scmp.lt.s32.totalorder %s540_s12, %s540_s12 }
  0x14   :  { %p547_p8 = por %p546_p7, %p545_p6 }
  0x16   :  { %p548_p9 = pnand %p547_p8, %p541_p5 }
  0x18   :  { %551 = shalt.err (!%p548_p9)
}
  0x19   :  { %25 = dma.hbm_to_vmem [thread:$0]  %s726_s0, 128, %s23_s9, [#allocation3]  }
  0x1a   :  { %s560_s15 = scalar_lea.vmem %s46_s11, 1024  ;;  %p565_p11 = scmp.lt.s32.totalorder %s46_s11, %s46_s11 }
  0x1b   :  { %p561_p10 = scmp.ne.s32.totalorder %s46_s11, %s560_s15  ;;  %p566_p12 = scmp.lt.s32.totalorder %s560_s15, %s560_s15 }
  0x1d   :  { %p567_p13 = por %p566_p12, %p565_p11 }
  0x1f   :  { %p568_p0 = pnand %p567_p13, %p561_p10 }
  0x21   :  { %571 = shalt.err (!%p568_p0)
}
  0x22   :  { %51 = dma.hbm_to_vmem [thread:$0]  %s729_s3, 1024, %s46_s11, [#allocation6], %s621_s27, %s621_s27, %s622_s28  }
  0x23   :  { %s625_s17 = smov [#allocation8]  }
  0x24   :  { %s59_s18 = sshll.u32 %s625_s17, 4  ;;  %s60_s18 = int_to_ptr.vmem [resolvable:$true] %s59_s18 }
  0x25   :  { %s580_s19 = scalar_lea.vmem %s60_s18, 1024  ;;  %p585_p2 = scmp.lt.s32.totalorder %s60_s18, %s60_s18 }
  0x26   :  { %p581_p1 = scmp.ne.s32.totalorder %s60_s18, %s580_s19  ;;  %p586_p3 = scmp.lt.s32.totalorder %s580_s19, %s580_s19 }
  0x28   :  { %p587_p4 = por %p586_p3, %p585_p2 }
  0x2a   :  { %p588_p5 = pnand %p587_p4, %p581_p1 }
  0x2c   :  { %591 = shalt.err (!%p588_p5)
}
  0x2d   :  { %65 = dma.hbm_to_vmem [thread:$0]  %s731_s5, 1024, %s60_s18, [#allocation9], %s621_s27, %s621_s27, %s622_s28  }
  0x2e   :  { %612 = dma.done.wait [#allocation3], 128  }
  0x2f   :  { %613 = vsyncadd [#allocation3], 4294967168 }
  0x30   :  { %614 = dma.done.wait [#allocation6], 1280  }
  0x31   :  { %615 = vsyncadd [#allocation6], 4294966016 }
  0x32   :  { %616 = dma.done.wait [#allocation9], 1024  }
  0x33   :  { %617 = vsyncadd [#allocation9], 4294966272  ;;  %v626_v0 = vmov 0.0   ;;  %vm627_vm0 = vmmov 0   ;;  %v494_v1 = vld [vmem:[#allocation5 + $0x8] sm:$0xff]   ;;  %v495_v2 = vld [vmem:[#allocation5] sm:$0xff]  }
  0x34   :  { %437 = vmatprep.subr.bf16.mxu0 %v626_v0  ;;  %441 = vmatprep.mubr.msk.bf16.mxu0 %vm627_vm0, %v626_v0  ;;  %v81_v3 = vld [vmem:[#allocation2] sm:$0xff]  ;;  %v496_v4 = vld [vmem:[#allocation7 + $0x38] sm:$0xff]   ;;  %v497_v6 = vld [vmem:[#allocation7 + $0x30] sm:$0xff]   ;;  %vm106_vm1 = vcmask 261120   ;;  %s628_s24 = smov [#allocation10]  }
  0x35   :  { %445 = vmatprep.subr.bf16.mxu1 %v626_v0  ;;  %461 = vmatprep.mubr.msk.bf16.mxu1 %vm627_vm0, %v626_v0  ;;  %v82_v5 = vpack.c.bf16 %v81_v3, %v81_v3  ;;  %v498_v7 = vld [vmem:[#allocation7 + $0x28] sm:$0xff]   ;;  %v499_v8 = vld [vmem:[#allocation7 + $0x20] sm:$0xff]   ;;  %v500_v9 = vld [vmem:[#allocation7 + $0x18] sm:$0xff]   ;;  %s383_s25 = sshll.u32 %s628_s24, 4  ;;  %s384_s25 = int_to_ptr.vmem [resolvable:$true] %s383_s25 }
  0x36   :  { %438 = vmatpush3.bf16.msra.mxu0 %v494_v1  ;;  %446 = vmatpush3.bf16.msra.mxu1 %v496_v4  ;;  %v501_v10 = vld [vmem:[#allocation7 + $0x10] sm:$0xff]   ;;  %v502_v11 = vld [vmem:[#allocation7 + $0x8] sm:$0xff]   ;;  %v503_v12 = vld [vmem:[#allocation7] sm:$0xff]   ;;  %p597_p7 = scmp.lt.s32.totalorder %s384_s25, %s384_s25 }
  0x37   :  { %439 = vmatprep.subr.bf16.mxu0 %v626_v0  ;;  %447 = vmatprep.subr.bf16.mxu1 %v626_v0  ;;  %v504_v13 = vld [vmem:[#allocation8 + $0x38] sm:$0xff]   ;;  %v505_v14 = vld [vmem:[#allocation8 + $0x30] sm:$0xff]   ;;  %v506_v15 = vld [vmem:[#allocation8 + $0x28] sm:$0xff]  }
  0x38   :  { %v507_v16 = vld [vmem:[#allocation8 + $0x20] sm:$0xff]   ;;  %v508_v17 = vld [vmem:[#allocation8 + $0x18] sm:$0xff]   ;;  %v509_v18 = vld [vmem:[#allocation8 + $0x10] sm:$0xff]  }
  0x39   :  { %v394_v19 = vld [vmem:[%s728_s2] ss:$0 sm:$0xff]  ;;  %v511_v28 = vld [vmem:[#allocation8] sm:$0xff]  }
  0x3a   :  { %440 = vmatpush3.bf16.msra.mxu0 %v495_v2  ;;  %448 = vmatpush3.bf16.msra.mxu1 %v497_v6  ;;  %v510_v27 = vld [vmem:[#allocation8 + $0x8] sm:$0xff]  }
  0x3b   :  { %465 = vmatprep.subr.bf16.mxu0 %v626_v0  ;;  %449 = vmatprep.subr.bf16.mxu1 %v626_v0  ;;  %v398_v29 = vld [vmem:[%s730_s4] ss:$0 sm:$0xff]  ;;  %s592_s4 = scalar_lea.vmem %s384_s25, 128 }
  0x3c   :  { %v407_v37 = vld [vmem:[%s732_s6] ss:$0 sm:$0xff]  ;;  %p593_p6 = scmp.ne.s32.totalorder %s384_s25, %s592_s4  ;;  %p598_p8 = scmp.lt.s32.totalorder %s592_s4, %s592_s4 }
  0x3d   :  { %442 = vmatmul.mubr.msk.bf16.vlgmr.msra.gmra.mxu0 %vm106_vm1, %v82_v5 }
  0x3e   :  { %481 = vmatprep.mubr.msk.bf16.mxu0 %vm627_vm0, %v626_v0  ;;  %450 = vmatpush3.bf16.msra.mxu1 %v498_v7  ;;  %p599_p9 = por %p598_p8, %p597_p7 }
  0x3f   :  { %451 = vmatprep.subr.bf16.mxu1 %v626_v0  ;;  %466 = vmatpush3.bf16.msra.mxu0 %v504_v13 }
  0x40   :  { %467 = vmatprep.subr.bf16.mxu0 %v626_v0  ;;  %p600_p10 = pnand %p599_p9, %p593_p6 }
  0x42   :  { %452 = vmatpush3.bf16.msra.mxu1 %v499_v8 }
  0x43   :  { %453 = vmatprep.subr.bf16.mxu1 %v626_v0  ;;  %468 = vmatpush3.bf16.msra.mxu0 %v505_v14 }
  0x44   :  { %469 = vmatprep.subr.bf16.mxu0 %v626_v0 }
  0x46   :  { %454 = vmatpush3.bf16.msra.mxu1 %v500_v9 }
  0x47   :  { %455 = vmatprep.subr.bf16.mxu1 %v626_v0  ;;  %470 = vmatpush3.bf16.msra.mxu0 %v506_v15 }
  0x48   :  { %471 = vmatprep.subr.bf16.mxu0 %v626_v0 }
  0x4a   :  { %456 = vmatpush3.bf16.msra.mxu1 %v501_v10 }
  0x4b   :  { %457 = vmatprep.subr.bf16.mxu1 %v626_v0  ;;  %472 = vmatpush3.bf16.msra.mxu0 %v507_v16 }
  0x4c   :  { %473 = vmatprep.subr.bf16.mxu0 %v626_v0 }
  0x4e   :  { %458 = vmatpush3.bf16.msra.mxu1 %v502_v11 }
  0x4f   :  { %459 = vmatprep.subr.bf16.mxu1 %v626_v0  ;;  %474 = vmatpush3.bf16.msra.mxu0 %v508_v17 }
  0x50   :  { %475 = vmatprep.subr.bf16.mxu0 %v626_v0 }
  0x52   :  { %460 = vmatpush3.bf16.msra.mxu1 %v503_v12 }
  0x53   :  { %476 = vmatpush3.bf16.msra.mxu0 %v509_v18 }
  0x54   :  { %477 = vmatprep.subr.bf16.mxu0 %v626_v0 }
  0x57   :  { %478 = vmatpush3.bf16.msra.mxu0 %v510_v27 }
  0x58   :  { %479 = vmatprep.subr.bf16.mxu0 %v626_v0 }
  0x5b   :  { %480 = vmatpush3.bf16.msra.mxu0 %v511_v28 }
  0xfd   :  { %v144_v20 = vpop.f32.mrf.mxu0 }
  0xfe   :  { %v145_v21 = vadd.f32 %v394_v19, %v144_v20 }
  0xff   :  { %v443_v22 = vpop.f32.mrf.mxu0 }
 0x100   :  { %v150_v23 = vmax.f32 %v145_v21, 0.0 }
 0x101   :  { %v147_v24 = vpop.f32.mrf.mxu0 }
 0x102   :  { %v151_v25 = vpack.c.bf16 %v150_v23, %v150_v23 }
 0x103   :  { %v444_v26 = vpop.f32.mrf.mxu0 }
 0x104   :  { %462 = vmatmul.mubr.bf16.vlgmr.msra.gmra.mxu1 %v151_v25 }
 0x1c4   :  { %v257_v30 = vpop.f32.mrf.mxu1 }
 0x1c5   :  { %v258_v31 = vadd.f32 %v398_v29, %v257_v30 }
 0x1c6   :  { %v463_v32 = vpop.f32.mrf.mxu1 }
 0x1c7   :  { %v263_v33 = vmax.f32 %v258_v31, 0.0 }
 0x1c8   :  { %v260_v34 = vpop.f32.mrf.mxu1 }
 0x1c9   :  { %v264_v35 = vpack.c.bf16 %v263_v33, %v263_v33 }
 0x1ca   :  { %v464_v36 = vpop.f32.mrf.mxu1 }
 0x1cb   :  { %482 = vmatmul.mubr.bf16.vlgmr.msra.gmra.mxu0 %v264_v35 }
 0x28b   :  { %v370_v38 = vpop.f32.mrf.mxu0 }
 0x28c   :  { %v371_v39 = vadd.f32 %v407_v37, %v370_v38 }
 0x28d   :  { %v483_v40 = vpop.f32.mrf.mxu0 }
 0x28e   :  { %376 = vst [vmem:[#allocation10] sm:$0xff] %v371_v39 }
 0x28f   :  { %v373_v41 = vpop.f32.mrf.mxu0 }
 0x290   :  { %603 = shalt.err (!%p600_p10)
}
 0x291   :  { %386 = dma.vmem_to_hbm [thread:$0]  %s384_s25, 128, %s733_s7, [#allocation4]   ;;  %v484_v42 = vpop.f32.mrf.mxu0 }
 0x292   :  { %618 = dma.done.wait [#allocation4], 128  }
 0x293   :  { %619 = vsyncadd [#allocation4], 4294967168 }
 0x294   :  { %390 = vsyncpa [#allocation3], 1 }
 0x295   :  { %391 = vsyncpa [#allocation6], 1 }
 0x296   :  { %392 = vsyncpa [#allocation9], 1 }
 0x297   :  { %393 = vsyncpa [#allocation4], 1 }

</bundles_post_ra>
